<compile_context>
chip_gen: v7x
topology: tpu7x:2x2x1
jax: 0.10.0
libtpu: 0.0.40
codegen_flags: <defaults>
</compile_context>

<pallas_src>
import math

import jax
import jax.numpy as jnp
from jax.experimental import pallas as pl
from jax.experimental.pallas import tpu as pltpu

# ----------------------------------------------------------------------------
# Small synthetic configuration
# ----------------------------------------------------------------------------
BATCH = 2
IMG_C, IMG_HW, PATCH = 3, 16, 8
PATCH_DIM = IMG_C * PATCH * PATCH              # 192
VIS_TOKENS = (IMG_HW // PATCH) ** 2 + 1        # 4 patches + CLS = 5 tokens
SEQ_LEN = 8
VOCAB = 64
HIDDEN = 32
MLP_HIDDEN = 4 * HIDDEN                        # 128
EMBED_DIM = 32
LN_EPS = 1e-5

SLAB_COLS = 128                                # lane width of both weight slabs

# bf16 matmul-weight slab row offsets (all multiples of 16 => clean bf16
# sublane packing for the static row slices taken inside the kernel).
R_QKV = 0                                # (H, 3H)   [wq*scale | wk | wv]
R_WO = R_QKV + HIDDEN                    # 32  (H, H)
R_W1 = R_WO + HIDDEN                     # 64  (H, 4H)
R_W2 = R_W1 + HIDDEN                     # 96  (4H, H)
R_PROJ = R_W2 + MLP_HIDDEN               # 224 (H, 128)  proj zero-padded to 128 lanes
R_PATCH = R_PROJ + HIDDEN                # 256 (PATCH_DIM, H)  vision slab only
MM_ROWS_TEXT = R_PATCH                   # 256
MM_ROWS_VIS = R_PATCH + PATCH_DIM        # 448

# f32 bias / LN-param slab rows (gamma row, beta row adjacent).
ROW_LN1_G, ROW_LN1_B = 0, 1
ROW_QKV_B = 2                            # (1, 3H)  [bq*scale | bk | bv]
ROW_BO = 3
ROW_LN2_G, ROW_LN2_B = 4, 5
ROW_B1 = 6                               # (1, 4H)
ROW_B2 = 7
ROW_LNF_G, ROW_LNF_B = 8, 9
ROW_TOKBIAS = 10                         # vision only: pos_emb, +cls on row 0
SC_ROWS = 16


# ----------------------------------------------------------------------------
# Pure-JAX reference math (f32, unfused) — used only for the sanity check.
# ----------------------------------------------------------------------------
def _gelu_tanh(x):
    return 0.5 * x * (1.0 + jnp.tanh(0.7978845608028654 * (x + 0.044715 * x * x * x)))


def _layernorm_ref(h, g, b):
    mu = jnp.mean(h, axis=-1, keepdims=True)
    var = jnp.mean((h - mu) ** 2, axis=-1, keepdims=True)
    return (h - mu) * jax.lax.rsqrt(var + LN_EPS) * g + b


def _encoder_math(x, attn_bias, pool_w, w):
    """x:(B,T,H)  attn_bias:(B,1,T)  pool_w:(B,T)  ->  (B, EMBED_DIM)."""
    scale = 1.0 / math.sqrt(x.shape[-1])
    h = _layernorm_ref(x, w["ln1_g"], w["ln1_b"])
    q = jnp.einsum("bth,hd->btd", h, w["wq"]) + w["bq"]
    k = jnp.einsum("bth,hd->btd", h, w["wk"]) + w["bk"]
    v = jnp.einsum("bth,hd->btd", h, w["wv"]) + w["bv"]
    s = jnp.einsum("bqd,bkd->bqk", q, k) * scale + attn_bias
    s = s - jnp.max(s, axis=-1, keepdims=True)
    p = jnp.exp(s)
    p = p / jnp.sum(p, axis=-1, keepdims=True)
    a = jnp.einsum("bqk,bkd->bqd", p, v)
    a = jnp.einsum("btd,dh->bth", a, w["wo"]) + w["bo"]
    x = x + a
    h = _layernorm_ref(x, w["ln2_g"], w["ln2_b"])
    m = jnp.einsum("bth,hf->btf", h, w["w1"]) + w["b1"]
    m = _gelu_tanh(m)
    m = jnp.einsum("btf,fh->bth", m, w["w2"]) + w["b2"]
    x = x + m
    h = _layernorm_ref(x, w["lnf_g"], w["lnf_b"])
    pooled = jnp.sum(pool_w[:, :, None] * h, axis=1)
    return jnp.dot(pooled, w["proj"])


# ----------------------------------------------------------------------------
# In-kernel math (bf16 matmul operands, f32 accumulation / elementwise)
# ----------------------------------------------------------------------------
def _ln_from_slab(h, sc_ref, g_row):
    """LayerNorm over the last dim; gamma at g_row, beta at g_row+1 of sc slab."""
    g = sc_ref[g_row:g_row + 1, 0:HIDDEN]
    b = sc_ref[g_row + 1:g_row + 2, 0:HIDDEN]
    mu = jnp.mean(h, axis=-1, keepdims=True)
    var = jnp.mean((h - mu) ** 2, axis=-1, keepdims=True)
    return (h - mu) * jax.lax.rsqrt(var + LN_EPS) * g + b


def _transformer_block(x, attn_bias, mm_ref, sc_ref):
    """x:(B,T,H) f32, attn_bias:(B,1,T) f32 or None -> post-final-LN (B,T,H)."""
    B, T, H = x.shape
    bf16 = jnp.bfloat16
    x2 = x.reshape(B * T, H)                                  # flatten for weight matmuls

    # --- pre-LN single-head self-attention, fused QKV ---
    h = _ln_from_slab(x2, sc_ref, ROW_LN1_G)
    qkv = jnp.dot(h.astype(bf16), mm_ref[R_QKV:R_QKV + H, 0:3 * H],
                  preferred_element_type=jnp.float32)
    qkv = qkv + sc_ref[ROW_QKV_B:ROW_QKV_B + 1, 0:3 * H]
    qkv = qkv.reshape(B, T, 3 * H)
    q = qkv[..., 0:H]                  # 1/sqrt(H) already folded into wq / bq
    k = qkv[..., H:2 * H]
    v = qkv[..., 2 * H:3 * H]
    s = jnp.einsum("bqd,bkd->bqk", q.astype(bf16), k.astype(bf16),
                   preferred_element_type=jnp.float32)
    if attn_bias is not None:
        s = s + attn_bias              # additive padding mask (-1e9 on pad keys)
    s = s - jnp.max(s, axis=-1, keepdims=True)
    p = jnp.exp(s)
    p = p * pl.reciprocal(jnp.sum(p, axis=-1, keepdims=True), approx=True)
    a = jnp.einsum("bqk,bkd->bqd", p.astype(bf16), v.astype(bf16),
                   preferred_element_type=jnp.float32).reshape(B * T, H)
    a = jnp.dot(a.astype(bf16), mm_ref[R_WO:R_WO + H, 0:H],
                preferred_element_type=jnp.float32)
    a = a + sc_ref[ROW_BO:ROW_BO + 1, 0:H]
    x2 = x2 + a

    # --- GELU MLP ---
    h = _ln_from_slab(x2, sc_ref, ROW_LN2_G)
    m = jnp.dot(h.astype(bf16), mm_ref[R_W1:R_W1 + H, 0:MLP_HIDDEN],
                preferred_element_type=jnp.float32)
    m = m + sc_ref[ROW_B1:ROW_B1 + 1, 0:MLP_HIDDEN]
    m = _gelu_tanh(m)
    m = jnp.dot(m.astype(bf16), mm_ref[R_W2:R_W2 + MLP_HIDDEN, 0:H],
                preferred_element_type=jnp.float32)
    m = m + sc_ref[ROW_B2:ROW_B2 + 1, 0:H]
    x2 = x2 + m

    # --- final LN ---
    return _ln_from_slab(x2, sc_ref, ROW_LNF_G).reshape(B, T, H)


def _project(pooled, mm_ref):
    """(B,H) -> (B, SLAB_COLS) lane-dense output (proj zero-padded to 128)."""
    return jnp.dot(pooled.astype(jnp.bfloat16), mm_ref[R_PROJ:R_PROJ + HIDDEN, :],
                   preferred_element_type=jnp.float32)


# ----------------------------------------------------------------------------
# Pallas kernels (one fused kernel per path)
# ----------------------------------------------------------------------------
def _text_encoder_kernel(x_ref, mask_ref, mm_ref, sc_ref, out_ref):
    x = x_ref[...]                                   # (B,S,H) f32 (token+pos emb)
    mask = mask_ref[...]                             # (B,S) f32
    attn_bias = ((1.0 - mask) * -1e9)[:, None, :]    # (B,1,S); rows never fully masked
    h = _transformer_block(x, attn_bias, mm_ref, sc_ref)
    pool_w = mask / jnp.sum(mask, axis=-1, keepdims=True)      # masked mean
    pooled = jnp.sum(pool_w[:, :, None] * h, axis=1)           # (B,H)
    out_ref[...] = _project(pooled, mm_ref)


def _image_encoder_kernel(patch_ref, mm_ref, sc_ref, out_ref):
    B, T, PD = patch_ref.shape                       # (B, VIS_TOKENS, PATCH_DIM); row 0 zero
    p = patch_ref[...].reshape(B * T, PD).astype(jnp.bfloat16)
    x = jnp.dot(p, mm_ref[R_PATCH:R_PATCH + PD, 0:HIDDEN],     # patch-embed "conv"
                preferred_element_type=jnp.float32).reshape(B, T, HIDDEN)
    # token bias = pos_emb with cls_token pre-added on row 0 (row-0 patch is zero)
    x = x + sc_ref[ROW_TOKBIAS:ROW_TOKBIAS + T, 0:HIDDEN][None]
    h = _transformer_block(x, None, mm_ref, sc_ref)
    pooled = h[:, 0, :]                              # CLS pooling
    out_ref[...] = _project(pooled, mm_ref)


_VMEM = pl.BlockSpec(memory_space=pltpu.MemorySpace.VMEM)


def _text_encoder_call(x, mask, mm_slab, sc_slab):
    return pl.pallas_call(
        _text_encoder_kernel,
        out_shape=jax.ShapeDtypeStruct((x.shape[0], SLAB_COLS), jnp.float32),
        in_specs=[_VMEM] * 4,
        out_specs=_VMEM,
    )(x, mask, mm_slab, sc_slab)


def _image_encoder_call(patches, mm_slab, sc_slab):
    return pl.pallas_call(
        _image_encoder_kernel,
        out_shape=jax.ShapeDtypeStruct((patches.shape[0], SLAB_COLS), jnp.float32),
        in_specs=[_VMEM] * 3,
        out_specs=_VMEM,
    )(patches, mm_slab, sc_slab)


# ----------------------------------------------------------------------------
# Weight packing into VMEM slabs
# ----------------------------------------------------------------------------
def _pack_mm_slab(p, patch_proj=None):
    rows = MM_ROWS_VIS if patch_proj is not None else MM_ROWS_TEXT
    slab = jnp.zeros((rows, SLAB_COLS), jnp.float32)
    scale = 1.0 / math.sqrt(HIDDEN)
    qkv = jnp.concatenate([p["wq"] * scale, p["wk"], p["wv"]], axis=1)   # (H,3H)
    slab = slab.at[R_QKV:R_QKV + HIDDEN, 0:3 * HIDDEN].set(qkv)
    slab = slab.at[R_WO:R_WO + HIDDEN, 0:HIDDEN].set(p["wo"])
    slab = slab.at[R_W1:R_W1 + HIDDEN, 0:MLP_HIDDEN].set(p["w1"])
    slab = slab.at[R_W2:R_W2 + MLP_HIDDEN, 0:HIDDEN].set(p["w2"])
    slab = slab.at[R_PROJ:R_PROJ + HIDDEN, 0:EMBED_DIM].set(p["proj"])
    if patch_proj is not None:
        slab = slab.at[R_PATCH:R_PATCH + PATCH_DIM, 0:HIDDEN].set(patch_proj)
    return slab.astype(jnp.bfloat16)


def _pack_sc_slab(p, token_bias=None):
    slab = jnp.zeros((SC_ROWS, SLAB_COLS), jnp.float32)
    scale = 1.0 / math.sqrt(HIDDEN)
    qkv_b = jnp.concatenate([p["bq"] * scale, p["bk"], p["bv"]], axis=1)  # (1,3H)
    slab = slab.at[ROW_LN1_G:ROW_LN1_G + 1, 0:HIDDEN].set(p["ln1_g"])
    slab = slab.at[ROW_LN1_B:ROW_LN1_B + 1, 0:HIDDEN].set(p["ln1_b"])
    slab = slab.at[ROW_QKV_B:ROW_QKV_B + 1, 0:3 * HIDDEN].set(qkv_b)
    slab = slab.at[ROW_BO:ROW_BO + 1, 0:HIDDEN].set(p["bo"])
    slab = slab.at[ROW_LN2_G:ROW_LN2_G + 1, 0:HIDDEN].set(p["ln2_g"])
    slab = slab.at[ROW_LN2_B:ROW_LN2_B + 1, 0:HIDDEN].set(p["ln2_b"])
    slab = slab.at[ROW_B1:ROW_B1 + 1, 0:MLP_HIDDEN].set(p["b1"])
    slab = slab.at[ROW_B2:ROW_B2 + 1, 0:HIDDEN].set(p["b2"])
    slab = slab.at[ROW_LNF_G:ROW_LNF_G + 1, 0:HIDDEN].set(p["lnf_g"])
    slab = slab.at[ROW_LNF_B:ROW_LNF_B + 1, 0:HIDDEN].set(p["lnf_b"])
    if token_bias is not None:
        slab = slab.at[ROW_TOKBIAS:ROW_TOKBIAS + VIS_TOKENS, 0:HIDDEN].set(token_bias)
    return slab


# ----------------------------------------------------------------------------
# Glue (plain JAX, fused under jit): gathers / patchify / mask prep
# ----------------------------------------------------------------------------
def _patchify(image):
    """NCHW image -> (B, P, C*ph*pw) patches, PyTorch Conv2d flattening order."""
    b = image.shape[0]
    g = IMG_HW // PATCH
    p = image.reshape(b, IMG_C, g, PATCH, g, PATCH)
    p = p.transpose(0, 2, 4, 1, 3, 5).reshape(b, g * g, PATCH_DIM)
    return p


@jax.jit
def _encode_text_fn(token_emb, text_pos_emb, mm_slab, sc_slab, input_ids, attention_mask):
    x = jnp.take(token_emb, input_ids, axis=0) + text_pos_emb[None]
    mask = attention_mask.astype(jnp.float32)
    out = _text_encoder_call(x, mask, mm_slab, sc_slab)
    return out[:, :EMBED_DIM]


@jax.jit
def _encode_image_fn(mm_slab, sc_slab, image):
    patches = _patchify(image)
    # Prepend a zero "CLS patch" row; the (cls + pos) token bias is added in-kernel.
    patches = jnp.pad(patches, ((0, 0), (1, 0), (0, 0)))       # (B, VIS_TOKENS, PATCH_DIM)
    out = _image_encoder_call(patches, mm_slab, sc_slab)
    return out[:, :EMBED_DIM]


# ----------------------------------------------------------------------------
# Deterministic parameter initialisation
# ----------------------------------------------------------------------------
def _init_encoder_params(key, hidden, mlp_hidden, embed_dim):
    ks = jax.random.split(key, 7)
    s = 0.02
    f32 = jnp.float32
    return {
        "ln1_g": jnp.ones((1, hidden), f32), "ln1_b": jnp.zeros((1, hidden), f32),
        "wq": s * jax.random.normal(ks[0], (hidden, hidden), f32),
        "bq": jnp.zeros((1, hidden), f32),
        "wk": s * jax.random.normal(ks[1], (hidden, hidden), f32),
        "bk": jnp.zeros((1, hidden), f32),
        "wv": s * jax.random.normal(ks[2], (hidden, hidden), f32),
        "bv": jnp.zeros((1, hidden), f32),
        "wo": s * jax.random.normal(ks[3], (hidden, hidden), f32),
        "bo": jnp.zeros((1, hidden), f32),
        "ln2_g": jnp.ones((1, hidden), f32), "ln2_b": jnp.zeros((1, hidden), f32),
        "w1": s * jax.random.normal(ks[4], (hidden, mlp_hidden), f32),
        "b1": jnp.zeros((1, mlp_hidden), f32),
        "w2": s * jax.random.normal(ks[5], (mlp_hidden, hidden), f32),
        "b2": jnp.zeros((1, hidden), f32),
        "lnf_g": jnp.ones((1, hidden), f32), "lnf_b": jnp.zeros((1, hidden), f32),
        "proj": s * jax.random.normal(ks[6], (hidden, embed_dim), f32),
    }


# ----------------------------------------------------------------------------
# The benchmark wrapper module
# ----------------------------------------------------------------------------
class JaCLIPForBenchmark:
    """enable to do model.encode_text(dict_tensor)  (Pallas-TPU version)."""

    def __init__(self, key):
        kt, kv, ke = jax.random.split(key, 3)
        self.text_params = _init_encoder_params(kt, HIDDEN, MLP_HIDDEN, EMBED_DIM)
        self.vision_params = _init_encoder_params(kv, HIDDEN, MLP_HIDDEN, EMBED_DIM)
        k1, k2, k3, k4, k5 = jax.random.split(ke, 5)
        f32 = jnp.float32
        self.token_emb = 0.02 * jax.random.normal(k1, (VOCAB, HIDDEN), f32)
        self.text_pos_emb = 0.02 * jax.random.normal(k2, (SEQ_LEN, HIDDEN), f32)
        self.patch_proj = 0.02 * jax.random.normal(k3, (PATCH_DIM, HIDDEN), f32)
        self.cls_token = 0.02 * jax.random.normal(k4, (1, 1, HIDDEN), f32)
        self.vis_pos_emb = 0.02 * jax.random.normal(k5, (VIS_TOKENS, HIDDEN), f32)

        # Pre-packed VMEM slabs (one bf16 matmul slab + one f32 bias slab per path).
        self.text_mm_slab = _pack_mm_slab(self.text_params)
        self.text_sc_slab = _pack_sc_slab(self.text_params)
        vis_token_bias = self.vis_pos_emb.at[0].add(self.cls_token[0, 0])
        self.vis_mm_slab = _pack_mm_slab(self.vision_params, patch_proj=self.patch_proj)
        self.vis_sc_slab = _pack_sc_slab(self.vision_params, token_bias=vis_token_bias)

    # ---------------- public API (matches the PyTorch wrapper) --------------
    def encode_text(self, dict_tensor):
        return _encode_text_fn(self.token_emb, self.text_pos_emb,
                               self.text_mm_slab, self.text_sc_slab,
                               dict_tensor["input_ids"], dict_tensor["attention_mask"])

    def encode_image(self, image):
        return _encode_image_fn(self.vis_mm_slab, self.vis_sc_slab, image)

    def __call__(self, *args, **kwargs):
        # Matches the PyTorch module: forward() returns NotImplemented.
        return NotImplemented

    # ---------------- pure-JAX f32 references (numerical sanity check) ------
    def _encode_text_ref(self, dict_tensor):
        mask = dict_tensor["attention_mask"].astype(jnp.float32)
        x = jnp.take(self.token_emb, dict_tensor["input_ids"], axis=0) + self.text_pos_emb[None]
        attn_bias = ((1.0 - mask) * -1e9)[:, None, :]
        pool_w = mask / jnp.sum(mask, axis=-1, keepdims=True)
        return _encoder_math(x, attn_bias, pool_w, self.text_params)

    def _encode_image_ref(self, image):
        emb = jnp.einsum("bpd,dh->bph", _patchify(image), self.patch_proj)
        b = emb.shape[0]
        x = jnp.concatenate(
            [jnp.broadcast_to(self.cls_token, (b, 1, HIDDEN)), emb], axis=1)
        x = x + self.vis_pos_emb[None]
        attn_bias = jnp.zeros((b, 1, x.shape[1]), jnp.float32)
        pool_w = jnp.zeros((b, x.shape[1]), jnp.float32).at[:, 0].set(1.0)
        return _encoder_math(x, attn_bias, pool_w, self.vision_params)


# ----------------------------------------------------------------------------
if __name__ == "__main__":
    key = jax.random.PRNGKey(0)
    k_model, k_img, k_ids = jax.random.split(key, 3)

    model = JaCLIPForBenchmark(k_model)

    image = jax.random.normal(k_img, (BATCH, IMG_C, IMG_HW, IMG_HW), jnp.float32)
    input_ids = jax.random.randint(k_ids, (BATCH, SEQ_LEN), 0, VOCAB, jnp.int32)
    attention_mask = jnp.array([[1, 1, 1, 1, 1, 1, 1, 1],
                                [1, 1, 1, 1, 1, 0, 0, 0]], jnp.int32)
    dict_tensor = {"input_ids": input_ids, "attention_mask": attention_mask}

    text_feat = model.encode_text(dict_tensor)      # (B, EMBED_DIM)
    img_feat = model.encode_image(image)            # (B, EMBED_DIM)
    jax.block_until_ready((text_feat, img_feat))

    # Numerical sanity check against the pure-JAX f32 reference (kernel uses
    # bf16 matmul operands + approx reciprocal, hence the loose tolerance).
    text_ref = model._encode_text_ref(dict_tensor)
    img_ref = model._encode_image_ref(image)
    err_t = float(jnp.max(jnp.abs(text_feat - text_ref)))
    err_i = float(jnp.max(jnp.abs(img_feat - img_ref)))
    assert text_feat.shape == (BATCH, EMBED_DIM) and img_feat.shape == (BATCH, EMBED_DIM)
    assert err_t < 5e-2 and err_i < 5e-2, (err_t, err_i)

    # forward() parity with the PyTorch module.
    assert model() is NotImplemented

    print("KERNEL_OK")
</pallas_src>

<mosaic_0001>
module attributes {stable_mosaic.version = 11 : i64} {
  func.func @_text_encoder_kernel(%arg0: memref<2x8x32xf32, #tpu.memory_space<vmem>>, %arg1: memref<2x8xf32, #tpu.memory_space<vmem>>, %arg2: memref<256x128xbf16, #tpu.memory_space<vmem>>, %arg3: memref<16x128xf32, #tpu.memory_space<vmem>>, %arg4: memref<2x128xf32, #tpu.memory_space<vmem>>) attributes {dimension_semantics = [], scalar_prefetch = 0 : i64, scratch_operands = 0 : i64, tpu.core_type = #tpu.core_type<tc>} {
    %c0 = arith.constant 0 : index
    %c0_0 = arith.constant 0 : index
    %c0_1 = arith.constant 0 : index
    %0 = vector.load %arg0[%c0, %c0_0, %c0_1] : memref<2x8x32xf32, #tpu.memory_space<vmem>>, vector<2x8x32xf32>
    %c0_2 = arith.constant 0 : index
    %c0_3 = arith.constant 0 : index
    %1 = vector.load %arg1[%c0_2, %c0_3] : memref<2x8xf32, #tpu.memory_space<vmem>>, vector<2x8xf32>
    %cst = arith.constant 1.000000e+00 : f32
    %2 = vector.broadcast %cst : f32 to vector<2x8xf32>
    %3 = arith.subf %2, %1 : vector<2x8xf32>
    %cst_4 = arith.constant -1.000000e+09 : f32
    %4 = vector.broadcast %cst_4 : f32 to vector<2x8xf32>
    %5 = arith.mulf %3, %4 : vector<2x8xf32>
    %6 = vector.shape_cast %5 : vector<2x8xf32> to vector<2x1x8xf32>
    %7 = vector.shape_cast %0 : vector<2x8x32xf32> to vector<16x32xf32>
    %c0_5 = arith.constant 0 : index
    %c0_6 = arith.constant 0 : index
    %8 = vector.load %arg3[%c0_5, %c0_6] : memref<16x128xf32, #tpu.memory_space<vmem>>, vector<1x32xf32>
    %c1 = arith.constant 1 : index
    %c0_7 = arith.constant 0 : index
    %9 = vector.load %arg3[%c1, %c0_7] : memref<16x128xf32, #tpu.memory_space<vmem>>, vector<1x32xf32>
    %cst_8 = arith.constant dense<0.000000e+00> : vector<16xf32>
    %10 = vector.multi_reduction <add>, %7, %cst_8 [1] : vector<16x32xf32> to vector<16xf32>
    %11 = vector.shape_cast %10 : vector<16xf32> to vector<16x1xf32>
    %cst_9 = arith.constant 3.200000e+01 : f32
    %12 = vector.broadcast %cst_9 : f32 to vector<16x1xf32>
    %13 = arith.divf %11, %12 : vector<16x1xf32>
    %14 = vector.broadcast %13 : vector<16x1xf32> to vector<16x32xf32>
    %15 = arith.subf %7, %14 : vector<16x32xf32>
    %16 = arith.mulf %15, %15 : vector<16x32xf32>
    %cst_10 = arith.constant dense<0.000000e+00> : vector<16xf32>
    %17 = vector.multi_reduction <add>, %16, %cst_10 [1] : vector<16x32xf32> to vector<16xf32>
    %18 = vector.shape_cast %17 : vector<16xf32> to vector<16x1xf32>
    %cst_11 = arith.constant 3.200000e+01 : f32
    %19 = vector.broadcast %cst_11 : f32 to vector<16x1xf32>
    %20 = arith.divf %18, %19 : vector<16x1xf32>
    %21 = vector.broadcast %13 : vector<16x1xf32> to vector<16x32xf32>
    %22 = arith.subf %7, %21 : vector<16x32xf32>
    %cst_12 = arith.constant 9.99999974E-6 : f32
    %23 = vector.broadcast %cst_12 : f32 to vector<16x1xf32>
    %24 = arith.addf %20, %23 : vector<16x1xf32>
    %25 = math.rsqrt %24 : vector<16x1xf32>
    %26 = vector.broadcast %25 : vector<16x1xf32> to vector<16x32xf32>
    %27 = arith.mulf %22, %26 : vector<16x32xf32>
    %28 = vector.broadcast %8 : vector<1x32xf32> to vector<16x32xf32>
    %29 = arith.mulf %27, %28 : vector<16x32xf32>
    %30 = vector.broadcast %9 : vector<1x32xf32> to vector<16x32xf32>
    %31 = arith.addf %29, %30 : vector<16x32xf32>
    %32 = arith.truncf %31 : vector<16x32xf32> to vector<16x32xbf16>
    %c0_13 = arith.constant 0 : index
    %c0_14 = arith.constant 0 : index
    %33 = vector.load %arg2[%c0_13, %c0_14] : memref<256x128xbf16, #tpu.memory_space<vmem>>, vector<32x96xbf16>
    %cst_15 = arith.constant dense<0.000000e+00> : vector<16x96xf32>
    %34 = tpu.matmul %32, %33, %cst_15 {dimension_numbers = #tpu.dot_dimension_numbers<[1], [0], [0], [1], [0, 0, 1, 1], [], []>} : vector<16x32xbf16>, vector<32x96xbf16>, vector<16x96xf32> -> vector<16x96xf32>
    %c2 = arith.constant 2 : index
    %c0_16 = arith.constant 0 : index
    %35 = vector.load %arg3[%c2, %c0_16] : memref<16x128xf32, #tpu.memory_space<vmem>>, vector<1x96xf32>
    %36 = vector.broadcast %35 : vector<1x96xf32> to vector<16x96xf32>
    %37 = arith.addf %34, %36 : vector<16x96xf32>
    %38 = vector.shape_cast %37 : vector<16x96xf32> to vector<2x8x96xf32>
    %39 = vector.extract_strided_slice %38 {offsets = [0, 0, 0], sizes = [2, 8, 32], strides = [1, 1, 1]} : vector<2x8x96xf32> to vector<2x8x32xf32>
    %40 = vector.extract_strided_slice %38 {offsets = [0, 0, 32], sizes = [2, 8, 32], strides = [1, 1, 1]} : vector<2x8x96xf32> to vector<2x8x32xf32>
    %41 = vector.extract_strided_slice %38 {offsets = [0, 0, 64], sizes = [2, 8, 32], strides = [1, 1, 1]} : vector<2x8x96xf32> to vector<2x8x32xf32>
    %42 = arith.truncf %39 : vector<2x8x32xf32> to vector<2x8x32xbf16>
    %43 = arith.truncf %40 : vector<2x8x32xf32> to vector<2x8x32xbf16>
    "tpu.trace_start"() <{level = 10 : i32, message = "bqd,bkd->bqk"}> : () -> ()
    %cst_17 = arith.constant dense<0.000000e+00> : vector<2x8x8xf32>
    %44 = tpu.matmul %42, %43, %cst_17 {dimension_numbers = #tpu.dot_dimension_numbers<[2], [2], [1], [1], [0, 0, 0, 1, 1, 1], [0], [0]>} : vector<2x8x32xbf16>, vector<2x8x32xbf16>, vector<2x8x8xf32> -> vector<2x8x8xf32>
    "tpu.trace_stop"() : () -> ()
    %45 = vector.broadcast %6 : vector<2x1x8xf32> to vector<2x8x8xf32>
    %46 = arith.addf %44, %45 : vector<2x8x8xf32>
    %cst_18 = arith.constant dense<0xFF800000> : vector<2x8xf32>
    %47 = vector.multi_reduction <maximumf>, %46, %cst_18 [2] : vector<2x8x8xf32> to vector<2x8xf32>
    %48 = vector.shape_cast %47 : vector<2x8xf32> to vector<2x8x1xf32>
    %49 = vector.broadcast %48 : vector<2x8x1xf32> to vector<2x8x8xf32>
    %50 = arith.subf %46, %49 : vector<2x8x8xf32>
    %51 = math.exp %50 : vector<2x8x8xf32>
    %cst_19 = arith.constant dense<0.000000e+00> : vector<2x8xf32>
    %52 = vector.multi_reduction <add>, %51, %cst_19 [2] : vector<2x8x8xf32> to vector<2x8xf32>
    %53 = vector.shape_cast %52 : vector<2x8xf32> to vector<2x8x1xf32>
    %54 = tpu.reciprocal %53 {approx = true} : vector<2x8x1xf32> -> vector<2x8x1xf32>
    %55 = vector.broadcast %54 : vector<2x8x1xf32> to vector<2x8x8xf32>
    %56 = arith.mulf %51, %55 : vector<2x8x8xf32>
    %57 = arith.truncf %56 : vector<2x8x8xf32> to vector<2x8x8xbf16>
    %58 = arith.truncf %41 : vector<2x8x32xf32> to vector<2x8x32xbf16>
    "tpu.trace_start"() <{level = 10 : i32, message = "bqk,bkd->bqd"}> : () -> ()
    %cst_20 = arith.constant dense<0.000000e+00> : vector<2x8x32xf32>
    %59 = tpu.matmul %57, %58, %cst_20 {dimension_numbers = #tpu.dot_dimension_numbers<[2], [1], [1], [2], [0, 0, 0, 1, 1, 2], [0], [0]>} : vector<2x8x8xbf16>, vector<2x8x32xbf16>, vector<2x8x32xf32> -> vector<2x8x32xf32>
    "tpu.trace_stop"() : () -> ()
    %60 = vector.shape_cast %59 : vector<2x8x32xf32> to vector<16x32xf32>
    %61 = arith.truncf %60 : vector<16x32xf32> to vector<16x32xbf16>
    %c32 = arith.constant 32 : index
    %c0_21 = arith.constant 0 : index
    %62 = vector.load %arg2[%c32, %c0_21] : memref<256x128xbf16, #tpu.memory_space<vmem>>, vector<32x32xbf16>
    %cst_22 = arith.constant dense<0.000000e+00> : vector<16x32xf32>
    %63 = tpu.matmul %61, %62, %cst_22 {dimension_numbers = #tpu.dot_dimension_numbers<[1], [0], [0], [1], [0, 0, 1, 1], [], []>} : vector<16x32xbf16>, vector<32x32xbf16>, vector<16x32xf32> -> vector<16x32xf32>
    %c3 = arith.constant 3 : index
    %c0_23 = arith.constant 0 : index
    %64 = vector.load %arg3[%c3, %c0_23] : memref<16x128xf32, #tpu.memory_space<vmem>>, vector<1x32xf32>
    %65 = vector.broadcast %64 : vector<1x32xf32> to vector<16x32xf32>
    %66 = arith.addf %63, %65 : vector<16x32xf32>
    %67 = arith.addf %7, %66 : vector<16x32xf32>
    %c4 = arith.constant 4 : index
    %c0_24 = arith.constant 0 : index
    %68 = vector.load %arg3[%c4, %c0_24] : memref<16x128xf32, #tpu.memory_space<vmem>>, vector<1x32xf32>
    %c5 = arith.constant 5 : index
    %c0_25 = arith.constant 0 : index
    %69 = vector.load %arg3[%c5, %c0_25] : memref<16x128xf32, #tpu.memory_space<vmem>>, vector<1x32xf32>
    %cst_26 = arith.constant dense<0.000000e+00> : vector<16xf32>
    %70 = vector.multi_reduction <add>, %67, %cst_26 [1] : vector<16x32xf32> to vector<16xf32>
    %71 = vector.shape_cast %70 : vector<16xf32> to vector<16x1xf32>
    %cst_27 = arith.constant 3.200000e+01 : f32
    %72 = vector.broadcast %cst_27 : f32 to vector<16x1xf32>
    %73 = arith.divf %71, %72 : vector<16x1xf32>
    %74 = vector.broadcast %73 : vector<16x1xf32> to vector<16x32xf32>
    %75 = arith.subf %67, %74 : vector<16x32xf32>
    %76 = arith.mulf %75, %75 : vector<16x32xf32>
    %cst_28 = arith.constant dense<0.000000e+00> : vector<16xf32>
    %77 = vector.multi_reduction <add>, %76, %cst_28 [1] : vector<16x32xf32> to vector<16xf32>
    %78 = vector.shape_cast %77 : vector<16xf32> to vector<16x1xf32>
    %cst_29 = arith.constant 3.200000e+01 : f32
    %79 = vector.broadcast %cst_29 : f32 to vector<16x1xf32>
    %80 = arith.divf %78, %79 : vector<16x1xf32>
    %81 = vector.broadcast %73 : vector<16x1xf32> to vector<16x32xf32>
    %82 = arith.subf %67, %81 : vector<16x32xf32>
    %cst_30 = arith.constant 9.99999974E-6 : f32
    %83 = vector.broadcast %cst_30 : f32 to vector<16x1xf32>
    %84 = arith.addf %80, %83 : vector<16x1xf32>
    %85 = math.rsqrt %84 : vector<16x1xf32>
    %86 = vector.broadcast %85 : vector<16x1xf32> to vector<16x32xf32>
    %87 = arith.mulf %82, %86 : vector<16x32xf32>
    %88 = vector.broadcast %68 : vector<1x32xf32> to vector<16x32xf32>
    %89 = arith.mulf %87, %88 : vector<16x32xf32>
    %90 = vector.broadcast %69 : vector<1x32xf32> to vector<16x32xf32>
    %91 = arith.addf %89, %90 : vector<16x32xf32>
    %92 = arith.truncf %91 : vector<16x32xf32> to vector<16x32xbf16>
    %c64 = arith.constant 64 : index
    %c0_31 = arith.constant 0 : index
    %93 = vector.load %arg2[%c64, %c0_31] : memref<256x128xbf16, #tpu.memory_space<vmem>>, vector<32x128xbf16>
    %cst_32 = arith.constant dense<0.000000e+00> : vector<16x128xf32>
    %94 = tpu.matmul %92, %93, %cst_32 {dimension_numbers = #tpu.dot_dimension_numbers<[1], [0], [0], [1], [0, 0, 1, 1], [], []>} : vector<16x32xbf16>, vector<32x128xbf16>, vector<16x128xf32> -> vector<16x128xf32>
    %c6 = arith.constant 6 : index
    %c0_33 = arith.constant 0 : index
    %95 = vector.load %arg3[%c6, %c0_33] : memref<16x128xf32, #tpu.memory_space<vmem>>, vector<1x128xf32>
    %96 = vector.broadcast %95 : vector<1x128xf32> to vector<16x128xf32>
    %97 = arith.addf %94, %96 : vector<16x128xf32>
    %cst_34 = arith.constant 5.000000e-01 : f32
    %98 = vector.broadcast %cst_34 : f32 to vector<16x128xf32>
    %99 = arith.mulf %98, %97 : vector<16x128xf32>
    %cst_35 = arith.constant 4.471500e-02 : f32
    %100 = vector.broadcast %cst_35 : f32 to vector<16x128xf32>
    %101 = arith.mulf %100, %97 : vector<16x128xf32>
    %102 = arith.mulf %101, %97 : vector<16x128xf32>
    %103 = arith.mulf %102, %97 : vector<16x128xf32>
    %104 = arith.addf %97, %103 : vector<16x128xf32>
    %cst_36 = arith.constant 0.797884583 : f32
    %105 = vector.broadcast %cst_36 : f32 to vector<16x128xf32>
    %106 = arith.mulf %105, %104 : vector<16x128xf32>
    %107 = math.tanh %106 : vector<16x128xf32>
    %cst_37 = arith.constant 1.000000e+00 : f32
    %108 = vector.broadcast %cst_37 : f32 to vector<16x128xf32>
    %109 = arith.addf %108, %107 : vector<16x128xf32>
    %110 = arith.mulf %99, %109 : vector<16x128xf32>
    %111 = arith.truncf %110 : vector<16x128xf32> to vector<16x128xbf16>
    %c96 = arith.constant 96 : index
    %c0_38 = arith.constant 0 : index
    %112 = vector.load %arg2[%c96, %c0_38] : memref<256x128xbf16, #tpu.memory_space<vmem>>, vector<128x32xbf16>
    %cst_39 = arith.constant dense<0.000000e+00> : vector<16x32xf32>
    %113 = tpu.matmul %111, %112, %cst_39 {dimension_numbers = #tpu.dot_dimension_numbers<[1], [0], [0], [1], [0, 0, 1, 1], [], []>} : vector<16x128xbf16>, vector<128x32xbf16>, vector<16x32xf32> -> vector<16x32xf32>
    %c7 = arith.constant 7 : index
    %c0_40 = arith.constant 0 : index
    %114 = vector.load %arg3[%c7, %c0_40] : memref<16x128xf32, #tpu.memory_space<vmem>>, vector<1x32xf32>
    %115 = vector.broadcast %114 : vector<1x32xf32> to vector<16x32xf32>
    %116 = arith.addf %113, %115 : vector<16x32xf32>
    %117 = arith.addf %67, %116 : vector<16x32xf32>
    %c8 = arith.constant 8 : index
    %c0_41 = arith.constant 0 : index
    %118 = vector.load %arg3[%c8, %c0_41] : memref<16x128xf32, #tpu.memory_space<vmem>>, vector<1x32xf32>
    %c9 = arith.constant 9 : index
    %c0_42 = arith.constant 0 : index
    %119 = vector.load %arg3[%c9, %c0_42] : memref<16x128xf32, #tpu.memory_space<vmem>>, vector<1x32xf32>
    %cst_43 = arith.constant dense<0.000000e+00> : vector<16xf32>
    %120 = vector.multi_reduction <add>, %117, %cst_43 [1] : vector<16x32xf32> to vector<16xf32>
    %121 = vector.shape_cast %120 : vector<16xf32> to vector<16x1xf32>
    %cst_44 = arith.constant 3.200000e+01 : f32
    %122 = vector.broadcast %cst_44 : f32 to vector<16x1xf32>
    %123 = arith.divf %121, %122 : vector<16x1xf32>
    %124 = vector.broadcast %123 : vector<16x1xf32> to vector<16x32xf32>
    %125 = arith.subf %117, %124 : vector<16x32xf32>
    %126 = arith.mulf %125, %125 : vector<16x32xf32>
    %cst_45 = arith.constant dense<0.000000e+00> : vector<16xf32>
    %127 = vector.multi_reduction <add>, %126, %cst_45 [1] : vector<16x32xf32> to vector<16xf32>
    %128 = vector.shape_cast %127 : vector<16xf32> to vector<16x1xf32>
    %cst_46 = arith.constant 3.200000e+01 : f32
    %129 = vector.broadcast %cst_46 : f32 to vector<16x1xf32>
    %130 = arith.divf %128, %129 : vector<16x1xf32>
    %131 = vector.broadcast %123 : vector<16x1xf32> to vector<16x32xf32>
    %132 = arith.subf %117, %131 : vector<16x32xf32>
    %cst_47 = arith.constant 9.99999974E-6 : f32
    %133 = vector.broadcast %cst_47 : f32 to vector<16x1xf32>
    %134 = arith.addf %130, %133 : vector<16x1xf32>
    %135 = math.rsqrt %134 : vector<16x1xf32>
    %136 = vector.broadcast %135 : vector<16x1xf32> to vector<16x32xf32>
    %137 = arith.mulf %132, %136 : vector<16x32xf32>
    %138 = vector.broadcast %118 : vector<1x32xf32> to vector<16x32xf32>
    %139 = arith.mulf %137, %138 : vector<16x32xf32>
    %140 = vector.broadcast %119 : vector<1x32xf32> to vector<16x32xf32>
    %141 = arith.addf %139, %140 : vector<16x32xf32>
    %142 = vector.shape_cast %141 : vector<16x32xf32> to vector<2x8x32xf32>
    %cst_48 = arith.constant dense<0.000000e+00> : vector<2xf32>
    %143 = vector.multi_reduction <add>, %1, %cst_48 [1] : vector<2x8xf32> to vector<2xf32>
    %144 = vector.shape_cast %143 : vector<2xf32> to vector<2x1xf32>
    %145 = vector.broadcast %144 : vector<2x1xf32> to vector<2x8xf32>
    %146 = arith.divf %1, %145 : vector<2x8xf32>
    %147 = vector.shape_cast %146 : vector<2x8xf32> to vector<2x8x1xf32>
    %148 = vector.broadcast %147 : vector<2x8x1xf32> to vector<2x8x32xf32>
    %149 = arith.mulf %148, %142 : vector<2x8x32xf32>
    %cst_49 = arith.constant dense<0.000000e+00> : vector<2x32xf32>
    %150 = vector.multi_reduction <add>, %149, %cst_49 [1] : vector<2x8x32xf32> to vector<2x32xf32>
    %151 = arith.truncf %150 : vector<2x32xf32> to vector<2x32xbf16>
    %c224 = arith.constant 224 : index
    %c0_50 = arith.constant 0 : index
    %152 = vector.load %arg2[%c224, %c0_50] : memref<256x128xbf16, #tpu.memory_space<vmem>>, vector<32x128xbf16>
    %cst_51 = arith.constant dense<0.000000e+00> : vector<2x128xf32>
    %153 = tpu.matmul %151, %152, %cst_51 {dimension_numbers = #tpu.dot_dimension_numbers<[1], [0], [0], [1], [0, 0, 1, 1], [], []>} : vector<2x32xbf16>, vector<32x128xbf16>, vector<2x128xf32> -> vector<2x128xf32>
    %c0_52 = arith.constant 0 : index
    %c0_53 = arith.constant 0 : index
    %154 = vector.load %arg4[%c0_52, %c0_53] : memref<2x128xf32, #tpu.memory_space<vmem>>, vector<2x128xf32>
    tpu.vector_store %arg4[%c0_52, %c0_53], %153 {strides = array<i32>} : memref<2x128xf32, #tpu.memory_space<vmem>>, vector<2x128xf32>,
    return
  }
}

</mosaic_0001>

<bundles_post_ra>
// kernel: _encode_text_fn.1
= control target key start
LH: loop header
LB: loop body
LE: loop exit
PB: predicated region body
PF: predicated region fallthrough
CT: control target
= control target key end

     0   :  { %vm49_vm0 = vcmask 261120   ;;  %s1298_s0 = inlined_call_operand.vmem [shape: f32[2,8,32], index: 0, kind: input, shape index: {}]   ;;  %s1299_s1 = inlined_call_operand.vmem [shape: f32[2,8], index: 1, kind: input, shape index: {}]   ;;  %s1300_s2 = inlined_call_operand.vmem [shape: bf16[256,128], index: 2, kind: input, shape index: {}]   ;;  %s1301_s3 = inlined_call_operand.vmem [shape: f32[16,128], index: 3, kind: input, shape index: {}]   ;;  %s1302_s4 = inlined_call_operand.hbm [shape: f32[2,128], index: 4, kind: output, shape index: {}]  }
   0x1   :  { %v1096_v0 = vld [vmem:[%s1298_s0] sm:$0xff]  ;;  %v1101_v1 = vld [vmem:[%s1298_s0 + $0x8] sm:$0xff] }
   0x2   :  { %v50_v2 = vsel %vm49_vm0, %v1096_v0, 0.0  ;;  %v53_v3 = vsel %vm49_vm0, %v1101_v1, 0.0 }
   0x3   :  { %51 = vadd.xlane.f32.xlu0 %v50_v2 }
   0x7   :  { %54 = vadd.xlane.f32.xlu0 %v53_v3 }
   0x8   :  { %9 = vsyncpa [#allocation3], 0  ;;  %v996_v14 = vld [vmem:[%s1300_s2] sm:$0xff]   ;;  %v1062_v15 = vmov 0.0   ;;  %v997_v16 = vld [vmem:[%s1300_s2 + $0x8] sm:$0xff]   ;;  %vm1063_vm1 = vmmov 0   ;;  %v28_v49 = vlaneseq }
   0x9   :  { %914 = vmatprep.subr.bf16.mxu0 %v1062_v15  ;;  %934 = vmatprep.subr.bf16.mxu1 %v1062_v15  ;;  %v851_v25 = vld [vmem:[%s1301_s3] ss:$0 sm:$0xff]  ;;  %v852_v29 = vld [vmem:[%s1301_s3 + $0x1] ss:$0 sm:$0xff]  ;;  %v853_v34 = vld [vmem:[%s1301_s3 + $0x2] ss:$0 sm:$0xff] }
   0xa   :  { %915 = vmatpush3.bf16.msra.mxu0 %v996_v14  ;;  %918 = vmatprep.mubr.msk.bf16.mxu0 %vm1063_vm1, %v1062_v15  ;;  %s1064_s28 = smov 96   ;;  %v1065_v47 = vmov 1966171168   ;;  %v1154_v50 = vld [vmem:[%s1299_s1] sm:$0x3]  ;;  %v1157_v53 = vshrl.u32 %v28_v49, 7 }
   0xb   :  { %916 = vmatprep.subr.bf16.mxu0 %v1062_v15  ;;  %936 = vmatprep.mubr.msk.bf16.mxu1 %vm1063_vm1, %v1062_v15  ;;  %v26_v48 = vunpack.c.l.s4 %v1065_v47  ;;  %v22_v51 = vsub.f32 1.0, %v1154_v50  ;;  %vm265_vm2 = vcmask 64512   ;;  %s1066_s1 = smov 64   ;;  %vm295_vm3 = vcmask 1043456   ;;  %v861_v47 = vld [vmem:[%s1301_s3 + $0x3] ss:$0 sm:$0xff] }
   0xc   :  { %v1161_v58 = vsub.s32 0, %v1157_v53  ;;  %vm732_vm4 = vcmask 58368   ;;  %vm778_vm5 = vcmask 1041409  }
   0xd   :  { %v27_v52 = vunpack.c.0.s8 %v26_v48  ;;  %v23_v54 = vmul.f32 -1e+09, %v22_v51 }
   0xe   :  { %917 = vmatpush3.bf16.msra.mxu0 %v997_v16 }
   0xf   :  { %922 = vmatprep.subr.bf16.mxu0 %v1062_v15  ;;  %v30_v55 = vsub.s32 %v27_v52, %v1157_v53 }
  0x11   :  { %v31_v56 = vrot.slane %v23_v54, %v30_v55 }
  0x13   :  { %v39_v57 = vrot.slane %v31_v56, %v30_v55  ;;  %v32_v60 = vcombine.high %v31_v56, %v31_v56 }
  0x15   :  { %v160_v59 = vrot.slane %v39_v57, %v1161_v58  ;;  %v46_v2 = vrot.slane %v32_v60, %v30_v55 }
  0x90   :  { %v52_v4 = vpop.xlane.xlu0 %51 }
  0x91   :  { %v57_v5 = vmul.f32 0.03125, %v52_v4 }
  0x93   :  { %v59_v6 = vsub.f32 %v1096_v0, %v57_v5 }
  0x94   :  { %v55_v7 = vpop.xlane.xlu0 %54 }
  0x95   :  { %v58_v8 = vmul.f32 0.03125, %v55_v7  ;;  %v61_v9 = vmul.f32 %v59_v6, %v59_v6 }
  0x97   :  { %v60_v10 = vsub.f32 %v1101_v1, %v58_v8  ;;  %v63_v11 = vsel %vm49_vm0, %v61_v9, 0.0 }
  0x98   :  { %64 = vadd.xlane.f32.xlu1 %v63_v11 }
  0x99   :  { %v62_v12 = vmul.f32 %v60_v10, %v60_v10 }
  0x9b   :  { %v66_v13 = vsel %vm49_vm0, %v62_v12, 0.0 }
  0x9c   :  { %67 = vadd.xlane.f32.xlu1 %v66_v13 }
 0x125   :  { %v65_v17 = vpop.xlane.xlu1 %64 }
 0x126   :  { %v69_v18 = vmul.f32 0.03125, %v65_v17 }
 0x128   :  { %v71_v19 = vadd.f32 1e-05, %v69_v18 }
 0x129   :  { %v68_v20 = vpop.xlane.xlu1 %67 }
 0x12a   :  { %1012 = vrsqrt.f32 %v71_v19  ;;  %v70_v21 = vmul.f32 0.03125, %v68_v20 }
 0x12c   :  { %v72_v22 = vadd.f32 1e-05, %v70_v21 }
 0x12e   :  { %1014 = vrsqrt.f32 %v72_v22 }
 0x134   :  { %v1013_v23 = vpop.eup %1012 }
 0x135   :  { %v75_v24 = vmul.f32 %v1013_v23, %v59_v6  ;;  %v164_v6 = vrot.slane %v46_v2, %v1161_v58 }
 0x137   :  { %v81_v28 = vmul.f32 %v851_v25, %v75_v24 }
 0x138   :  { %v1015_v26 = vpop.eup %1014 }
 0x139   :  { %v76_v27 = vmul.f32 %v1015_v26, %v60_v10  ;;  %v87_v31 = vadd.f32 %v852_v29, %v81_v28 }
 0x13b   :  { %v82_v30 = vmul.f32 %v851_v25, %v76_v27 }
 0x13d   :  { %v88_v32 = vadd.f32 %v852_v29, %v82_v30 }
 0x13f   :  { %v89_v33 = vpack.c.bf16 %v88_v32, %v87_v31 }
 0x141   :  { %919 = vmatmul.mubr.msk.bf16.vlgmr.msra.gmra.mrb[0].mxu0 %vm49_vm0, %v89_v33 }
 0x142   :  { %924 = vmatprep.mubr.msk.bf16.mxu0 %vm1063_vm1, %v1062_v15 }
 0x214   :  { %v148_v35 = vpop.f32.mrb[0].mxu0 }
 0x215   :  { %v149_v36 = vadd.f32 %v853_v34, %v148_v35  ;;  %v920_v37 = vpop.f32.mrb[1].mxu0 }
 0x216   :  { %v151_v38 = vpop.f32.mrb[2].mxu0  ;;  %v999_v37 = vld [vmem:[%s1300_s2 + $0x18] sm:$0xff]  }
 0x217   :  { %v1137_v39 = vpack.c.bf16 %v149_v36, %v149_v36  ;;  %v152_v40 = vadd.f32 %v853_v34, %v151_v38  ;;  %v921_v41 = vpop.f32.mrb[3].mxu0  ;;  %v998_v36 = vld [vmem:[%s1300_s2 + $0x10] sm:$0xff]  }
 0x219   :  { %v156_v42 = vpack.c.bf16 %v152_v40, %v152_v40  ;;  %168 = vrot.lane.b32.xlu0 %v1137_v39, %s1064_s28 }
 0x21b   :  { %217 = vrot.lane.b32.xlu1 %v156_v42, %s1064_s28 }
 0x28b   :  { %v169_v43 = vpop.permute.xlu0 %168 }
 0x28c   :  { %v174_v44 = vsel %vm49_vm0, %v169_v43, 0 }
 0x28d   :  { %923 = vmatpush3.bf16.xpose.msra.mxu0 %v174_v44  ;;  %v218_v45 = vpop.permute.xlu1 %217 }
 0x28e   :  { %928 = vmatprep.subr.bf16.mxu0 %v1062_v15  ;;  %v223_v46 = vsel %vm49_vm0, %v218_v45, 0 }
 0x294   :  { %925 = vmatmul.mubr.msk.bf16.vlgmr.msra.gmra.mrb[4].mxu0 %vm49_vm0, %v1137_v39 }
 0x295   :  { %929 = vmatpush3.bf16.xpose.msra.mxu0 %v223_v46  ;;  %930 = vmatprep.mubr.msk.bf16.mxu0 %vm1063_vm1, %v1062_v15 }
 0x296   :  { %940 = vmatprep.subr.bf16.mxu0 %v1062_v15 }
 0x29c   :  { %931 = vmatmul.mubr.msk.bf16.vlgmr.msra.gmra.mrb[8].mxu0 %vm49_vm0, %v156_v42 }
 0x29d   :  { %942 = vmatprep.mubr.msk.bf16.mxu0 %vm1063_vm1, %v1062_v15 }
 0x367   :  { %v210_v61 = vpop.f32.mrb[4].mxu0 }
 0x368   :  { %v211_v62 = vadd.f32 %v210_v61, %v160_v59  ;;  %v926_v63 = vpop.f32.mrb[5].mxu0 }
 0x369   :  { %v213_v3 = vpop.f32.mrb[6].mxu0 }
 0x36a   :  { %v927_v4 = vpop.f32.mrb[7].mxu0  ;;  %v266_v5 = vsel %vm265_vm2, %v211_v62, -inf }
 0x36b   :  { %267 = vmax.xlane.f32.xlu1 %v266_v5 }
 0x36f   :  { %v259_v7 = vpop.f32.mrb[8].mxu0 }
 0x370   :  { %v260_v8 = vadd.f32 %v259_v7, %v164_v6  ;;  %v932_v9 = vpop.f32.mrb[9].mxu0  ;;  %v1000_v7 = vld [vmem:[%s1300_s2 + $0x20] sm:$0xff]  }
 0x371   :  { %v262_v10 = vpop.f32.mrb[10].mxu0 }
 0x372   :  { %v933_v11 = vpop.f32.mrb[11].mxu0  ;;  %v269_v12 = vsel %vm265_vm2, %v260_v8, -inf }
 0x373   :  { %270 = vmax.xlane.f32.xlu0 %v269_v12 }
 0x3f8   :  { %v268_v13 = vpop.xlane.xlu1 %267 }
 0x3f9   :  { %v272_v14 = vsub.f32 %v211_v62, %v268_v13 }
 0x3fb   :  { %v274_v16 = vmul.f32 1.442695, %v272_v14 }
 0x3fd   :  { %1016 = vpow2.f32 %v274_v16 }
 0x400   :  { %v271_v17 = vpop.xlane.xlu0 %270 }
 0x401   :  { %v273_v18 = vsub.f32 %v260_v8, %v271_v17  ;;  %v1001_v8 = vld [vmem:[%s1300_s2 + $0x28] sm:$0xff]   ;;  %v865_v17 = vld [vmem:[%s1301_s3 + $0x4] ss:$0 sm:$0xff] }
 0x403   :  { %v276_v19 = vmul.f32 1.442695, %v273_v18 }
 0x405   :  { %1018 = vpow2.f32 %v276_v19 }
 0x407   :  { %v1017_v20 = vpop.eup %1016 }
 0x408   :  { %v278_v21 = vsel %vm265_vm2, %v1017_v20, 0.0 }
 0x409   :  { %279 = vadd.xlane.f32.xlu0 %v278_v21 }
 0x40f   :  { %v1019_v22 = vpop.eup %1018 }
 0x410   :  { %v281_v23 = vsel %vm265_vm2, %v1019_v22, 0.0 }
 0x411   :  { %282 = vadd.xlane.f32.xlu1 %v281_v23 }
 0x41f   :  { %290 = vrot.lane.b32.xlu0 %v1137_v39, %s1066_s1 }
 0x422   :  { %339 = vrot.lane.b32.xlu1 %v156_v42, %s1066_s1 }
 0x496   :  { %v280_v24 = vpop.xlane.xlu0 %279 }
 0x497   :  { %1020 = vrcp.f32 %v280_v24 }
 0x49a   :  { %v291_v25 = vpop.permute.xlu0 %290 }
 0x49b   :  { %v297_v26 = vsel %vm295_vm3, %v291_v25, 0 }
 0x49c   :  { %935 = vmatpush3.bf16.msra.mxu1 %v297_v26 }
 0x49d   :  { %946 = vmatprep.subr.bf16.mxu1 %v1062_v15 }
 0x49e   :  { %v283_v27 = vpop.xlane.xlu1 %282 }
 0x49f   :  { %1022 = vrcp.f32 %v283_v27  ;;  %v1002_v27 = vld [vmem:[%s1300_s2 + $0x30] sm:$0xff]  }
 0x4a1   :  { %v1021_v28 = vpop.eup %1020 }
 0x4a2   :  { %v340_v29 = vpop.permute.xlu1 %339  ;;  %v286_v30 = vmul.f32 %v1021_v28, %v1017_v20  ;;  %v1003_v28 = vld [vmem:[%s1300_s2 + $0x38] sm:$0xff]  }
 0x4a3   :  { %v345_v31 = vsel %vm295_vm3, %v340_v29, 0  ;;  %v1004_v29 = vld [vmem:[%s1300_s2 + $0x40] sm:$0xff]  }
 0x4a4   :  { %941 = vmatpush3.bf16.msra.mxu0 %v345_v31  ;;  %v288_v32 = vpack.c.bf16 %v286_v30, %v286_v30  ;;  %v1005_v30 = vld [vmem:[%s1300_s2 + $0x48] sm:$0xff]   ;;  %v1006_v31 = vld [vmem:[%s1300_s2 + $0x50] sm:$0xff]  }
 0x4a5   :  { %954 = vmatprep.subr.bf16.mxu0 %v1062_v15 }
 0x4a6   :  { %937 = vmatmul.mubr.msk.bf16.vlgmr.msra.gmra.mrb[0].mxu1 %vm265_vm2, %v288_v32  ;;  %v1007_v32 = vld [vmem:[%s1300_s2 + $0x58] sm:$0xff]  }
 0x4a7   :  { %950 = vmatprep.mubr.msk.bf16.mxu1 %vm1063_vm1, %v1062_v15  ;;  %947 = vmatpush3.bf16.msra.mxu1 %v998_v36 }
 0x4a8   :  { %948 = vmatprep.subr.bf16.mxu1 %v1062_v15 }
 0x4a9   :  { %v1023_v33 = vpop.eup %1022 }
 0x4aa   :  { %v287_v34 = vmul.f32 %v1023_v33, %v1019_v22  ;;  %v866_v22 = vld [vmem:[%s1301_s3 + $0x5] ss:$0 sm:$0xff] }
 0x4ab   :  { %949 = vmatpush3.bf16.msra.mxu1 %v999_v37  ;;  %v1008_v33 = vld [vmem:[%s1300_s2 + $0x60] sm:$0xff]  }
 0x4ac   :  { %v289_v35 = vpack.c.bf16 %v287_v34, %v287_v34  ;;  %962 = vmatprep.subr.bf16.mxu1 %v1062_v15  ;;  %v1009_v34 = vld [vmem:[%s1300_s2 + $0x68] sm:$0xff]  }
 0x4ae   :  { %943 = vmatmul.mubr.msk.bf16.vlgmr.msra.gmra.mrb[12].mxu0 %vm265_vm2, %v289_v35  ;;  %v867_v35 = vld [vmem:[%s1301_s3 + $0x6] ss:$0 sm:$0xff] }
 0x4af   :  { %958 = vmatprep.mubr.msk.bf16.mxu0 %vm1063_vm1, %v1062_v15  ;;  %955 = vmatpush3.bf16.msra.mxu0 %v1000_v7 }
 0x4b0   :  { %956 = vmatprep.subr.bf16.mxu0 %v1062_v15 }
 0x4b3   :  { %957 = vmatpush3.bf16.msra.mxu0 %v1001_v8 }
 0x4b4   :  { %982 = vmatprep.subr.bf16.mxu0 %v1062_v15 }
 0x579   :  { %v333_v38 = vpop.f32.mrb[0].mxu1 }
 0x57a   :  { %v938_v39 = vpop.f32.mrb[1].mxu1 }
 0x57b   :  { %v336_v40 = vpop.f32.mrb[2].mxu1 }
 0x57c   :  { %v939_v41 = vpop.f32.mrb[3].mxu1 }
 0x581   :  { %v381_v42 = vpop.f32.mrb[12].mxu0 }
 0x582   :  { %v387_v43 = vpack.c.bf16 %v381_v42, %v333_v38  ;;  %v944_v44 = vpop.f32.mrb[13].mxu0 }
 0x583   :  { %v384_v45 = vpop.f32.mrb[14].mxu0 }
 0x584   :  { %v945_v46 = vpop.f32.mrb[15].mxu0  ;;  %951 = vmatmul.mubr.msk.bf16.vlgmr.msra.gmra.mrb[4].mxu1 %vm49_vm0, %v387_v43 }
 0x585   :  { %978 = vmatprep.mubr.msk.bf16.mxu1 %vm1063_vm1, %v1062_v15  ;;  %963 = vmatpush3.bf16.msra.mxu1 %v1002_v27  ;;  %v747_v27 = vsub.s32 1, %v1157_v53 }
 0x586   :  { %964 = vmatprep.subr.bf16.mxu1 %v1062_v15 }
 0x589   :  { %965 = vmatpush3.bf16.msra.mxu1 %v1003_v28 }
 0x58a   :  { %966 = vmatprep.subr.bf16.mxu1 %v1062_v15 }
 0x58d   :  { %967 = vmatpush3.bf16.msra.mxu1 %v1004_v29  ;;  %v1010_v29 = vld [vmem:[%s1300_s2 + $0x70] sm:$0xff]  }
 0x58e   :  { %968 = vmatprep.subr.bf16.mxu1 %v1062_v15 }
 0x591   :  { %969 = vmatpush3.bf16.msra.mxu1 %v1005_v30  ;;  %v1011_v30 = vld [vmem:[%s1300_s2 + $0x78] sm:$0xff]   ;;  %s1067_s2 = smov [#allocation2]  }
 0x592   :  { %970 = vmatprep.subr.bf16.mxu1 %v1062_v15 }
 0x595   :  { %971 = vmatpush3.bf16.msra.mxu1 %v1006_v31 }
 0x596   :  { %972 = vmatprep.subr.bf16.mxu1 %v1062_v15 }
 0x599   :  { %973 = vmatpush3.bf16.msra.mxu1 %v1007_v32 }
 0x59a   :  { %974 = vmatprep.subr.bf16.mxu1 %v1062_v15 }
 0x59d   :  { %975 = vmatpush3.bf16.msra.mxu1 %v1008_v33 }
 0x59e   :  { %976 = vmatprep.subr.bf16.mxu1 %v1062_v15 }
 0x5a1   :  { %977 = vmatpush3.bf16.msra.mxu1 %v1009_v34 }
 0x657   :  { %v446_v48 = vpop.f32.mrb[4].mxu1 }
 0x658   :  { %v447_v49 = vadd.f32 %v861_v47, %v446_v48  ;;  %v952_v51 = vpop.f32.mrb[5].mxu1 }
 0x659   :  { %v449_v52 = vpop.f32.mrb[6].mxu1 }
 0x65a   :  { %v1193_v54 = vadd.f32 %v447_v49, %v1096_v0  ;;  %v450_v55 = vadd.f32 %v861_v47, %v449_v52  ;;  %v953_v56 = vpop.f32.mrb[7].mxu1 }
 0x65c   :  { %v1196_v57 = vadd.f32 %v450_v55, %v1101_v1  ;;  %v457_v59 = vsel %vm49_vm0, %v1193_v54, 0.0 }
 0x65d   :  { %458 = vadd.xlane.f32.xlu1 %v457_v59 }
 0x65e   :  { %v460_v60 = vsel %vm49_vm0, %v1196_v57, 0.0 }
 0x65f   :  { %461 = vadd.xlane.f32.xlu0 %v460_v60 }
 0x6ea   :  { %v459_v61 = vpop.xlane.xlu1 %458 }
 0x6eb   :  { %v463_v62 = vmul.f32 0.03125, %v459_v61 }
 0x6ec   :  { %v462_v63 = vpop.xlane.xlu0 %461 }
 0x6ed   :  { %v465_v2 = vsub.f32 %v1193_v54, %v463_v62  ;;  %v464_v0 = vmul.f32 0.03125, %v462_v63 }
 0x6ef   :  { %v466_v3 = vsub.f32 %v1196_v57, %v464_v0  ;;  %v467_v4 = vmul.f32 %v465_v2, %v465_v2 }
 0x6f1   :  { %v469_v1 = vsel %vm49_vm0, %v467_v4, 0.0  ;;  %v468_v5 = vmul.f32 %v466_v3, %v466_v3 }
 0x6f2   :  { %470 = vadd.xlane.f32.xlu0 %v469_v1 }
 0x6f3   :  { %v472_v6 = vsel %vm49_vm0, %v468_v5, 0.0 }
 0x6f4   :  { %473 = vadd.xlane.f32.xlu1 %v472_v6 }
 0x77f   :  { %v471_v9 = vpop.xlane.xlu0 %470 }
 0x780   :  { %v475_v10 = vmul.f32 0.03125, %v471_v9 }
 0x781   :  { %v474_v11 = vpop.xlane.xlu1 %473 }
 0x782   :  { %v477_v12 = vadd.f32 1e-05, %v475_v10  ;;  %v476_v13 = vmul.f32 0.03125, %v474_v11 }
 0x784   :  { %1024 = vrsqrt.f32 %v477_v12  ;;  %v478_v14 = vadd.f32 1e-05, %v476_v13  ;;  %v733_v13 = vsel %vm732_vm4, %v1154_v50, 0.0 }
 0x786   :  { %1026 = vrsqrt.f32 %v478_v14 }
 0x78e   :  { %v1025_v16 = vpop.eup %1024 }
 0x78f   :  { %v481_v18 = vmul.f32 %v1025_v16, %v465_v2 }
 0x790   :  { %v1027_v19 = vpop.eup %1026 }
 0x791   :  { %v487_v20 = vmul.f32 %v865_v17, %v481_v18  ;;  %v482_v21 = vmul.f32 %v1027_v19, %v466_v3  ;;  %v871_v3 = vld [vmem:[%s1301_s3 + $0x7] ss:$0 sm:$0xff] }
 0x793   :  { %v488_v23 = vmul.f32 %v865_v17, %v482_v21  ;;  %v493_v24 = vadd.f32 %v866_v22, %v487_v20 }
 0x795   :  { %v494_v25 = vadd.f32 %v866_v22, %v488_v23 }
 0x797   :  { %v495_v26 = vpack.c.bf16 %v494_v25, %v493_v24 }
 0x799   :  { %959 = vmatmul.mubr.msk.bf16.vlgmr.msra.gmra.mrb[16].mxu0 %vm49_vm0, %v495_v26 }
 0x79a   :  { %986 = vmatprep.mubr.msk.bf16.mxu0 %vm1063_vm1, %v1062_v15  ;;  %983 = vmatpush3.bf16.msra.mxu0 %v1010_v29 }
 0x79b   :  { %984 = vmatprep.subr.bf16.mxu0 %v1062_v15 }
 0x79e   :  { %985 = vmatpush3.bf16.msra.mxu0 %v1011_v30 }
 0x86c   :  { %v554_v36 = vpop.f32.mrb[16].mxu0 }
 0x86d   :  { %v555_v37 = vadd.f32 %v867_v35, %v554_v36  ;;  %v960_v38 = vpop.f32.mrb[17].mxu0 }
 0x86e   :  { %v557_v39 = vpop.f32.mrb[18].mxu0 }
 0x86f   :  { %v563_v40 = vmul.f32 0.044715, %v555_v37  ;;  %v558_v41 = vadd.f32 %v867_v35, %v557_v39  ;;  %v961_v42 = vpop.f32.mrb[19].mxu0  ;;  %v561_v60 = vmul.f32 0.5, %v555_v37  ;;  %v880_v35 = vld [vmem:[%s1301_s3 + $0x8] ss:$0 sm:$0xff] }
 0x871   :  { %v565_v43 = vmul.f32 %v563_v40, %v555_v37  ;;  %v564_v44 = vmul.f32 0.044715, %v558_v41  ;;  %v562_v61 = vmul.f32 0.5, %v558_v41 }
 0x873   :  { %v567_v45 = vmul.f32 %v565_v43, %v555_v37  ;;  %v566_v46 = vmul.f32 %v564_v44, %v558_v41 }
 0x875   :  { %v569_v47 = vadd.f32 %v567_v45, %v555_v37  ;;  %v568_v48 = vmul.f32 %v566_v46, %v558_v41  ;;  %v881_v37 = vld [vmem:[%s1301_s3 + $0x9] ss:$0 sm:$0xff]  ;;  %s843_s3 = sshll.u32 %s1067_s2, 4  ;;  %s844_s3 = int_to_ptr.vmem [resolvable:$true] %s843_s3 }
 0x876   :  { %s1038_s0 = scalar_lea.vmem %s844_s3, 32  ;;  %p1043_p1 = scmp.lt.s32.totalorder %s844_s3, %s844_s3 }
 0x877   :  { %v571_v49 = vmul.f32 0.7978846, %v569_v47  ;;  %v570_v51 = vadd.f32 %v568_v48, %v558_v41  ;;  %p1039_p0 = scmp.ne.s32.totalorder %s844_s3, %s1038_s0  ;;  %p1044_p2 = scmp.lt.s32.totalorder %s1038_s0, %s1038_s0 }
 0x879   :  { %1028 = vtanh.f32 %v571_v49  ;;  %v572_v52 = vmul.f32 0.7978846, %v570_v51  ;;  %p1045_p3 = por %p1044_p2, %p1043_p1 }
 0x87b   :  { %1030 = vtanh.f32 %v572_v52  ;;  %p1046_p4 = pnand %p1045_p3, %p1039_p0 }
 0x883   :  { %v1029_v55 = vpop.eup %1028 }
 0x884   :  { %v575_v56 = vadd.f32 1.0, %v1029_v55 }
 0x885   :  { %v1031_v59 = vpop.eup %1030 }
 0x886   :  { %v576_v62 = vadd.f32 1.0, %v1031_v59  ;;  %v577_v63 = vmul.f32 %v575_v56, %v561_v60 }
 0x888   :  { %v578_v2 = vmul.f32 %v576_v62, %v562_v61 }
 0x88a   :  { %v579_v0 = vpack.c.bf16 %v578_v2, %v577_v63 }
 0x88c   :  { %979 = vmatmul.mubr.bf16.vlgmr.msra.gmra.mrb[8].mxu1 %v579_v0 }
 0x95f   :  { %v683_v4 = vpop.f32.mrb[8].mxu1 }
 0x960   :  { %v684_v1 = vadd.f32 %v871_v3, %v683_v4  ;;  %v980_v5 = vpop.f32.mrb[9].mxu1 }
 0x961   :  { %v686_v6 = vpop.f32.mrb[10].mxu1 }
 0x962   :  { %v687_v7 = vadd.f32 %v871_v3, %v686_v6  ;;  %v981_v8 = vpop.f32.mrb[11].mxu1  ;;  %v690_v9 = vadd.f32 %v684_v1, %v1193_v54 }
 0x964   :  { %v694_v10 = vsel %vm49_vm0, %v690_v9, 0.0  ;;  %v691_v11 = vadd.f32 %v687_v7, %v1196_v57 }
 0x965   :  { %695 = vadd.xlane.f32.xlu0 %v694_v10 }
 0x966   :  { %v697_v12 = vsel %vm49_vm0, %v691_v11, 0.0 }
 0x967   :  { %698 = vadd.xlane.f32.xlu1 %v697_v12 }
 0x969   :  { %734 = vadd.xlane.f32.xlu0 %v733_v13 }
 0x9f2   :  { %v696_v14 = vpop.xlane.xlu0 %695 }
 0x9f3   :  { %v700_v16 = vmul.f32 0.03125, %v696_v14 }
 0x9f4   :  { %v699_v17 = vpop.xlane.xlu1 %698 }
 0x9f5   :  { %v702_v18 = vsub.f32 %v690_v9, %v700_v16  ;;  %v701_v19 = vmul.f32 0.03125, %v699_v17 }
 0x9f6   :  { %v735_v20 = vpop.xlane.xlu0 %734 }
 0x9f7   :  { %v703_v21 = vsub.f32 %v691_v11, %v701_v19  ;;  %v704_v54 = vmul.f32 %v702_v18, %v702_v18  ;;  %1032 = vrcp.f32 %v735_v20 }
 0x9f9   :  { %v706_v22 = vsel %vm49_vm0, %v704_v54, 0.0  ;;  %v705_v23 = vmul.f32 %v703_v21, %v703_v21 }
 0x9fa   :  { %707 = vadd.xlane.f32.xlu1 %v706_v22 }
 0x9fb   :  { %v709_v57 = vsel %vm49_vm0, %v705_v23, 0.0 }
 0x9fc   :  { %710 = vadd.xlane.f32.xlu0 %v709_v57 }
 0xa01   :  { %v1033_v24 = vpop.eup %1032 }
 0xa02   :  { %v737_v25 = vmul.f32 %v1033_v24, %v1154_v50 }
 0xa04   :  { %v741_v26 = vrot.slane %v737_v25, %v1161_v58  ;;  %v748_v28 = vrot.slane %v737_v25, %v747_v27 }
 0xa0b   :  { %743 = vbcast.lane.b32.xlu1 %v741_v26, 256 }
 0xa12   :  { %750 = vbcast.lane.b32.xlu0 %v748_v28, 256 }
 0xa87   :  { %v708_v50 = vpop.xlane.xlu1 %707 }
 0xa88   :  { %v712_v31 = vmul.f32 0.03125, %v708_v50 }
 0xa89   :  { %v711_v58 = vpop.xlane.xlu0 %710 }
 0xa8a   :  { %v714_v32 = vadd.f32 1e-05, %v712_v31  ;;  %v713_v53 = vmul.f32 0.03125, %v711_v58 }
 0xa8b   :  { %v744_v40 = vpop.permute.xlu1 %743 }
 0xa8c   :  { %1034 = vrsqrt.f32 %v714_v32  ;;  %v715_v33 = vadd.f32 1e-05, %v713_v53 }
 0xa8d   :  { %v751_v43 = vpop.permute.xlu0 %750 }
 0xa8e   :  { %1036 = vrsqrt.f32 %v715_v33 }
 0xa96   :  { %v1035_v34 = vpop.eup %1034 }
 0xa97   :  { %v718_v36 = vmul.f32 %v1035_v34, %v702_v18 }
 0xa98   :  { %v1037_v15 = vpop.eup %1036 }
 0xa99   :  { %v724_v38 = vmul.f32 %v880_v35, %v718_v36  ;;  %v719_v39 = vmul.f32 %v1037_v15, %v703_v21 }
 0xa9b   :  { %v730_v41 = vadd.f32 %v881_v37, %v724_v38  ;;  %v725_v42 = vmul.f32 %v880_v35, %v719_v39 }
 0xa9d   :  { %v752_v44 = vmul.f32 %v744_v40, %v730_v41  ;;  %v731_v45 = vadd.f32 %v881_v37, %v725_v42 }
 0xa9f   :  { %v754_v46 = vsel %vm49_vm0, %v752_v44, 0.0  ;;  %v753_v47 = vmul.f32 %v751_v43, %v731_v45 }
 0xaa0   :  { %v755_v48 = vrot.slane %v754_v46, 4 }
 0xaa1   :  { %v761_v49 = vsel %vm49_vm0, %v753_v47, 0.0 }
 0xaa2   :  { %v756_v51 = vadd.f32 %v755_v48, %v754_v46  ;;  %v762_v52 = vrot.slane %v761_v49, 4 }
 0xaa4   :  { %v757_v55 = vrot.slane %v756_v51, 2  ;;  %v763_v56 = vadd.f32 %v762_v52, %v761_v49 }
 0xaa6   :  { %v758_v59 = vadd.f32 %v757_v55, %v756_v51  ;;  %v764_v60 = vrot.slane %v763_v56, 2 }
 0xaa8   :  { %v759_v61 = vrot.slane %v758_v59, 1  ;;  %v765_v62 = vadd.f32 %v764_v60, %v763_v56 }
 0xaaa   :  { %v760_v63 = vadd.f32 %v759_v61, %v758_v59  ;;  %v766_v2 = vrot.slane %v765_v62, 1 }
 0xaac   :  { %v768_v0 = vpack.c.bf16 %v760_v63, %v760_v63  ;;  %v767_v3 = vadd.f32 %v766_v2, %v765_v62 }
 0xaae   :  { %v769_v4 = vpack.c.bf16 %v767_v3, %v767_v3  ;;  %v776_v1 = vunpack.c.l.b16 %v768_v0 }
 0xab0   :  { %v777_v5 = vunpack.c.l.b16 %v769_v4 }
 0xab2   :  { %v779_v6 = vsel %vm778_vm5, %v777_v5, %v776_v1 }
 0xab3   :  { %v780_v7 = vpack.c.b16 %v779_v6, %v779_v6 }
 0xab5   :  { %987 = vmatmul.mubr.msk.bf16.vlgmr.msra.gmra.mrb[20].mxu0 %vm49_vm0, %v780_v7 }
 0xb88   :  { %v830_v8 = vpop.f32.mrb[20].mxu0 }
 0xb89   :  { %836 = vst [vmem:[#allocation2] sm:$0x3] %v830_v8  ;;  %v988_v9 = vpop.f32.mrb[21].mxu0 }
 0xb8a   :  { %v833_v10 = vpop.f32.mrb[22].mxu0 }
 0xb8b   :  { %1049 = shalt.err (!%p1046_p4)
}
 0xb8c   :  { %s1050_s21 = scalar_lea.hbm %s1302_s4, 32 }
 0xb8d   :  { %p1051_p5 = scmp.ne.s32.totalorder %s1302_s4, %s1050_s21  ;;  %p1054_p6 = scmp.lt.u32.totalorder %s1050_s21, %s1302_s4 }
 0xb8f   :  { %p1056_p7 = pnand %p1054_p6, %p1051_p5 }
 0xb91   :  { %1059 = shalt.err (!%p1056_p7)
}
 0xb92   :  { %846 = dma.vmem_to_hbm [thread:$0]  %s844_s3, 32, %s1302_s4, [#allocation3]   ;;  %v989_v11 = vpop.f32.mrb[23].mxu0 }
 0xb93   :  { %1060 = dma.done.wait [#allocation3], 32  }
 0xb94   :  { %1061 = vsyncadd [#allocation3], 4294967264 }
 0xb95   :  { %850 = vsyncpa [#allocation3], 1 }

</bundles_post_ra>
